<compile_context>
chip_gen: v6e
topology: v6e:2x2x1
jax: 0.10.0
libtpu: 0.0.40
codegen_flags: <defaults>
</compile_context>

<pallas_src>
import jax
import jax.numpy as jnp
from jax.experimental import pallas as pl
from jax.experimental.pallas import tpu as pltpu


def _round_up(x, m):
    return (x + m - 1) // m * m


def _device_kind():
    try:
        return jax.devices()[0].device_kind.lower()
    except Exception:
        return ""


def _row_tile_cap(kind):
    # v5e/v6e: 128 MiB VMEM, single TensorCore -> bigger tiles purely amortize
    # per-step pipeline overhead.  v7x (64 MiB VMEM, 2 TCs) / unknown: 2048.
    if "v5" in kind or "v6" in kind:
        return 4096
    return 2048


def _bf16_elementwise_ok(kind):
    # bf16 VALU path exists on v6e/v7x; keep f32 elementwise on v5e and older.
    if not kind:
        return False
    return not any(old in kind for old in ("v2", "v3", "v4", "v5"))


def _choose_row_tile(N, cap):
    if N <= 512:
        return _round_up(max(N, 8), 8)          # single tile
    # >= 2 tiles so ("parallel",) shards over v7x's two TensorCores.
    return min(cap, _round_up(pl.cdiv(N, 2), 8))


def _make_kernel(ew_bf16):
    bf = jnp.bfloat16

    def act(acc_f32, b_ref):
        # MXU accumulates in f32; bias-add + ReLU either on packed bf16 vregs
        # (v6e/v7x: halves VALU ops, ReLU exact in bf16) or in f32 (v5e).
        if ew_bf16:
            return jnp.maximum(acc_f32.astype(bf) + b_ref[...].astype(bf), 0.0)
        return jnp.maximum(acc_f32 + b_ref[...], 0.0).astype(bf)

    def kernel(x_ref,
               w1d_ref, b1d_ref, w2d_ref, b2d_ref,
               w1_ref, b1_ref, w2_ref, b2_ref,
               w3_ref, b3_ref, w4_ref, b4_ref,
               out_ref, dae_ref):
        x = x_ref[...].astype(bf)                                          # (tm, 2E)

        # --- DAE: Linear(2E->64)+Sigmoid, Linear(64->2E)+Sigmoid (f32 ewise,
        #     dae is a module output) ---
        h = jax.nn.sigmoid(
            jnp.dot(x, w1d_ref[...], preferred_element_type=jnp.float32)
            + b1d_ref[...])
        dae = jax.nn.sigmoid(
            jnp.dot(h.astype(bf), w2d_ref[...], preferred_element_type=jnp.float32)
            + b2d_ref[...])                                                # (tm, 2E) f32
        # Direct (tm, 2E) store: no in-kernel relayout; lane-dense once 2E >= 128.
        dae_ref[...] = dae.astype(dae_ref.dtype)

        # --- NCF: 2E->256->128->64->1, ReLU (dropout = eval-mode identity) ---
        d = dae.astype(bf)
        h1 = act(jnp.dot(d,  w1_ref[...], preferred_element_type=jnp.float32), b1_ref)
        h2 = act(jnp.dot(h1, w2_ref[...], preferred_element_type=jnp.float32), b2_ref)
        h3 = act(jnp.dot(h2, w3_ref[...], preferred_element_type=jnp.float32), b3_ref)
        o = jnp.dot(h3, w4_ref[...], preferred_element_type=jnp.float32) + b4_ref[...]
        out_ref[...] = jax.nn.sigmoid(o).astype(out_ref.dtype)            # (tm, 1)

    return kernel


def init_params(key, user_num, item_num, embedding_size):
    """Deterministic parameter init mirroring nn.Embedding / nn.Linear defaults."""
    E2 = 2 * embedding_size
    keys = jax.random.split(key, 8)

    def linear(k, fan_in, fan_out):
        kw, kb = jax.random.split(k)
        bound = 1.0 / jnp.sqrt(float(fan_in))
        w = jax.random.uniform(kw, (fan_in, fan_out), jnp.float32, -bound, bound)
        b = jax.random.uniform(kb, (1, fan_out), jnp.float32, -bound, bound)
        return w, b

    params = {
        "user_emb": jax.random.normal(keys[0], (user_num, embedding_size), jnp.float32),
        "item_emb": jax.random.normal(keys[1], (item_num, embedding_size), jnp.float32),
    }
    params["dae_w1"], params["dae_b1"] = linear(keys[2], E2, 64)
    params["dae_w2"], params["dae_b2"] = linear(keys[3], 64, E2)
    params["ncf_w1"], params["ncf_b1"] = linear(keys[4], E2, 256)
    params["ncf_w2"], params["ncf_b2"] = linear(keys[5], 256, 128)
    params["ncf_w3"], params["ncf_b3"] = linear(keys[6], 128, 64)
    params["ncf_w4"], params["ncf_b4"] = linear(keys[7], 64, 1)
    return params


@jax.jit
def dae_ncf_forward(params, user_matrix, item_matrix):
    """Returns (out, dae_out, embedding) matching the torch module (eval mode).

    Note: matmuls use bf16 operands with f32 accumulation (and bf16 elementwise
    on the NCF hidden layers on v6e/v7x) -> results match the f32 reference to
    within a few 1e-3 absolute, not bit-exactly.
    """
    # Glue: embedding gather + concat (dim=2).  `embedding` is a module output,
    # so it has to be materialized in HBM anyway; the kernel re-reads it as x.
    user_e = jnp.take(params["user_emb"], user_matrix, axis=0)   # (B, S, E)
    item_e = jnp.take(params["item_emb"], item_matrix, axis=0)   # (B, S, E)
    embedding = jnp.concatenate([user_e, item_e], axis=2)        # (B, S, 2E)

    B, S, F = embedding.shape
    N = B * S
    x = embedding.reshape(N, F)

    kind = _device_kind()
    tm = _choose_row_tile(N, _row_tile_cap(kind))
    num_tiles = pl.cdiv(N, tm)   # no jnp.pad: partial last block handled by Pallas
    ew_bf16 = _bf16_elementwise_ok(kind)

    # bf16 weights (MXU-native); biases stay f32 (cast in-kernel if needed).
    bf = jnp.bfloat16
    weight_args = (
        params["dae_w1"].astype(bf), params["dae_b1"],
        params["dae_w2"].astype(bf), params["dae_b2"],
        params["ncf_w1"].astype(bf), params["ncf_b1"],
        params["ncf_w2"].astype(bf), params["ncf_b2"],
        params["ncf_w3"].astype(bf), params["ncf_b3"],
        params["ncf_w4"].astype(bf), params["ncf_b4"],
    )
    # Constant index_map -> Pallas keeps each weight block resident (no re-DMA).
    weight_specs = [
        pl.BlockSpec(w.shape, lambda i, nd=w.ndim: (0,) * nd) for w in weight_args
    ]

    # Advisory cost estimate (lets XLA schedule gather/concat around the call).
    flops_per_row = 2 * (F * 64 + 64 * F + F * 256 + 256 * 128 + 128 * 64 + 64 * 1)
    weight_bytes = sum(int(w.size) * w.dtype.itemsize for w in weight_args)
    cost = pl.CostEstimate(
        flops=N * flops_per_row,
        transcendentals=N * (64 + F + 1),
        bytes_accessed=N * F * 4 + N * F * 4 + N * 4 + weight_bytes,
    )

    out2d, dae2d = pl.pallas_call(
        _make_kernel(ew_bf16),
        grid=(num_tiles,),
        in_specs=[pl.BlockSpec((tm, F), lambda i: (i, 0))] + weight_specs,
        out_specs=[
            pl.BlockSpec((tm, 1), lambda i: (i, 0)),
            pl.BlockSpec((tm, F), lambda i: (i, 0)),
        ],
        out_shape=(
            jax.ShapeDtypeStruct((N, 1), jnp.float32),
            jax.ShapeDtypeStruct((N, F), jnp.float32),
        ),
        compiler_params=pltpu.CompilerParams(
            dimension_semantics=("parallel",),
            vmem_limit_bytes=(64 if tm > 2048 else 32) * 1024 * 1024,
        ),
        cost_estimate=cost,
    )(x, *weight_args)

    out = out2d.reshape(B, S)          # squeeze(2)
    dae_out = dae2d.reshape(B, S, F)
    return out, dae_out, embedding


def _reference(params, user_matrix, item_matrix):
    """Pure-JAX f32 reference of the torch module (eval mode)."""
    user_e = jnp.take(params["user_emb"], user_matrix, axis=0)
    item_e = jnp.take(params["item_emb"], item_matrix, axis=0)
    emb = jnp.concatenate([user_e, item_e], axis=2)
    h = jax.nn.sigmoid(emb @ params["dae_w1"] + params["dae_b1"])
    dae = jax.nn.sigmoid(h @ params["dae_w2"] + params["dae_b2"])
    h1 = jnp.maximum(dae @ params["ncf_w1"] + params["ncf_b1"], 0.0)
    h2 = jnp.maximum(h1 @ params["ncf_w2"] + params["ncf_b2"], 0.0)
    h3 = jnp.maximum(h2 @ params["ncf_w3"] + params["ncf_b3"], 0.0)
    out = jax.nn.sigmoid(h3 @ params["ncf_w4"] + params["ncf_b4"])[..., 0]
    return out, dae, emb


if __name__ == "__main__":
    user_num, item_num, embedding_size = 50, 100, 32
    B, S = 2, 8

    key = jax.random.PRNGKey(0)
    k_params, k_u, k_i = jax.random.split(key, 3)
    params = init_params(k_params, user_num, item_num, embedding_size)

    user_matrix = jax.random.randint(k_u, (B, S), 0, user_num, dtype=jnp.int32)
    item_matrix = jax.random.randint(k_i, (B, S), 0, item_num, dtype=jnp.int32)

    out, dae_out, embedding = dae_ncf_forward(params, user_matrix, item_matrix)
    jax.block_until_ready((out, dae_out, embedding))

    assert out.shape == (B, S)
    assert dae_out.shape == (B, S, 2 * embedding_size)
    assert embedding.shape == (B, S, 2 * embedding_size)

    # Loose tolerance: kernel uses bf16 matmul operands (and bf16 elementwise on
    # the NCF hidden layers on v6e/v7x) with f32 accumulation.
    ref_out, ref_dae, ref_emb = _reference(params, user_matrix, item_matrix)
    assert float(jnp.max(jnp.abs(embedding - ref_emb))) == 0.0
    assert float(jnp.max(jnp.abs(out - ref_out))) < 5e-2
    assert float(jnp.max(jnp.abs(dae_out - ref_dae))) < 5e-2

    print("KERNEL_OK")
</pallas_src>

<mosaic_0001>
module attributes {stable_mosaic.version = 11 : i64} {
  func.func @kernel(%arg0: i32, %arg1: memref<16x64xf32, #tpu.memory_space<vmem>>, %arg2: memref<64x64xbf16, #tpu.memory_space<vmem>>, %arg3: memref<1x64xf32, #tpu.memory_space<vmem>>, %arg4: memref<64x64xbf16, #tpu.memory_space<vmem>>, %arg5: memref<1x64xf32, #tpu.memory_space<vmem>>, %arg6: memref<64x256xbf16, #tpu.memory_space<vmem>>, %arg7: memref<1x256xf32, #tpu.memory_space<vmem>>, %arg8: memref<256x128xbf16, #tpu.memory_space<vmem>>, %arg9: memref<1x128xf32, #tpu.memory_space<vmem>>, %arg10: memref<128x64xbf16, #tpu.memory_space<vmem>>, %arg11: memref<1x64xf32, #tpu.memory_space<vmem>>, %arg12: memref<64x1xbf16, #tpu.memory_space<vmem>>, %arg13: memref<1x1xf32, #tpu.memory_space<vmem>>, %arg14: memref<16x1xf32, #tpu.memory_space<vmem>>, %arg15: memref<16x64xf32, #tpu.memory_space<vmem>>) attributes {dimension_semantics = [#tpu.dimension_semantics<parallel>], iteration_bounds = array<i64: 1>, scalar_prefetch = 0 : i64, scratch_operands = 0 : i64, tpu.core_type = #tpu.core_type<tc>, window_params = [{transform_indices = @transform_0, window_bounds = array<i64: 16, 64>}, {pipeline_mode = #tpu.pipeline_mode<synchronous>, transform_indices = @transform_1, window_bounds = array<i64: 64, 64>}, {pipeline_mode = #tpu.pipeline_mode<synchronous>, transform_indices = @transform_2, window_bounds = array<i64: 1, 64>}, {pipeline_mode = #tpu.pipeline_mode<synchronous>, transform_indices = @transform_3, window_bounds = array<i64: 64, 64>}, {pipeline_mode = #tpu.pipeline_mode<synchronous>, transform_indices = @transform_4, window_bounds = array<i64: 1, 64>}, {pipeline_mode = #tpu.pipeline_mode<synchronous>, transform_indices = @transform_5, window_bounds = array<i64: 64, 256>}, {pipeline_mode = #tpu.pipeline_mode<synchronous>, transform_indices = @transform_6, window_bounds = array<i64: 1, 256>}, {pipeline_mode = #tpu.pipeline_mode<synchronous>, transform_indices = @transform_7, window_bounds = array<i64: 256, 128>}, {pipeline_mode = #tpu.pipeline_mode<synchronous>, transform_indices = @transform_8, window_bounds = array<i64: 1, 128>}, {pipeline_mode = #tpu.pipeline_mode<synchronous>, transform_indices = @transform_9, window_bounds = array<i64: 128, 64>}, {pipeline_mode = #tpu.pipeline_mode<synchronous>, transform_indices = @transform_10, window_bounds = array<i64: 1, 64>}, {pipeline_mode = #tpu.pipeline_mode<synchronous>, transform_indices = @transform_11, window_bounds = array<i64: 64, 1>}, {pipeline_mode = #tpu.pipeline_mode<synchronous>, transform_indices = @transform_12, window_bounds = array<i64: 1, 1>}, {transform_indices = @transform_13, window_bounds = array<i64: 16, 1>}, {transform_indices = @transform_14, window_bounds = array<i64: 16, 64>}]} {
    %c0 = arith.constant 0 : index
    %c0_0 = arith.constant 0 : index
    %0 = vector.load %arg1[%c0, %c0_0] : memref<16x64xf32, #tpu.memory_space<vmem>>, vector<16x64xf32>
    %1 = arith.truncf %0 : vector<16x64xf32> to vector<16x64xbf16>
    %c0_1 = arith.constant 0 : index
    %c0_2 = arith.constant 0 : index
    %2 = vector.load %arg2[%c0_1, %c0_2] : memref<64x64xbf16, #tpu.memory_space<vmem>>, vector<64x64xbf16>
    %cst = arith.constant dense<0.000000e+00> : vector<16x64xf32>
    %3 = tpu.matmul %1, %2, %cst {dimension_numbers = #tpu.dot_dimension_numbers<[1], [0], [0], [1], [0, 0, 1, 1], [], []>} : vector<16x64xbf16>, vector<64x64xbf16>, vector<16x64xf32> -> vector<16x64xf32>
    %c0_3 = arith.constant 0 : index
    %c0_4 = arith.constant 0 : index
    %4 = vector.load %arg3[%c0_3, %c0_4] : memref<1x64xf32, #tpu.memory_space<vmem>>, vector<1x64xf32>
    %5 = vector.broadcast %4 : vector<1x64xf32> to vector<16x64xf32>
    %6 = arith.addf %3, %5 : vector<16x64xf32>
    %7 = arith.negf %6 : vector<16x64xf32>
    %8 = math.exp %7 : vector<16x64xf32>
    %cst_5 = arith.constant 1.000000e+00 : f32
    %9 = vector.broadcast %cst_5 : f32 to vector<16x64xf32>
    %10 = arith.addf %9, %8 : vector<16x64xf32>
    %11 = arith.divf %9, %10 : vector<16x64xf32>
    %12 = arith.truncf %11 : vector<16x64xf32> to vector<16x64xbf16>
    %c0_6 = arith.constant 0 : index
    %c0_7 = arith.constant 0 : index
    %13 = vector.load %arg4[%c0_6, %c0_7] : memref<64x64xbf16, #tpu.memory_space<vmem>>, vector<64x64xbf16>
    %cst_8 = arith.constant dense<0.000000e+00> : vector<16x64xf32>
    %14 = tpu.matmul %12, %13, %cst_8 {dimension_numbers = #tpu.dot_dimension_numbers<[1], [0], [0], [1], [0, 0, 1, 1], [], []>} : vector<16x64xbf16>, vector<64x64xbf16>, vector<16x64xf32> -> vector<16x64xf32>
    %c0_9 = arith.constant 0 : index
    %c0_10 = arith.constant 0 : index
    %15 = vector.load %arg5[%c0_9, %c0_10] : memref<1x64xf32, #tpu.memory_space<vmem>>, vector<1x64xf32>
    %16 = vector.broadcast %15 : vector<1x64xf32> to vector<16x64xf32>
    %17 = arith.addf %14, %16 : vector<16x64xf32>
    %18 = arith.negf %17 : vector<16x64xf32>
    %19 = math.exp %18 : vector<16x64xf32>
    %cst_11 = arith.constant 1.000000e+00 : f32
    %20 = vector.broadcast %cst_11 : f32 to vector<16x64xf32>
    %21 = arith.addf %20, %19 : vector<16x64xf32>
    %22 = arith.divf %20, %21 : vector<16x64xf32>
    %c0_12 = arith.constant 0 : index
    %c0_13 = arith.constant 0 : index
    %23 = vector.load %arg15[%c0_12, %c0_13] : memref<16x64xf32, #tpu.memory_space<vmem>>, vector<16x64xf32>
    tpu.vector_store %arg15[%c0_12, %c0_13], %22 {strides = array<i32>} : memref<16x64xf32, #tpu.memory_space<vmem>>, vector<16x64xf32>,
    %24 = arith.truncf %22 : vector<16x64xf32> to vector<16x64xbf16>
    %c0_14 = arith.constant 0 : index
    %c0_15 = arith.constant 0 : index
    %25 = vector.load %arg6[%c0_14, %c0_15] : memref<64x256xbf16, #tpu.memory_space<vmem>>, vector<64x256xbf16>
    %cst_16 = arith.constant dense<0.000000e+00> : vector<16x256xf32>
    %26 = tpu.matmul %24, %25, %cst_16 {dimension_numbers = #tpu.dot_dimension_numbers<[1], [0], [0], [1], [0, 0, 1, 1], [], []>} : vector<16x64xbf16>, vector<64x256xbf16>, vector<16x256xf32> -> vector<16x256xf32>
    %27 = arith.truncf %26 : vector<16x256xf32> to vector<16x256xbf16>
    %c0_17 = arith.constant 0 : index
    %c0_18 = arith.constant 0 : index
    %28 = vector.load %arg7[%c0_17, %c0_18] : memref<1x256xf32, #tpu.memory_space<vmem>>, vector<1x256xf32>
    %29 = arith.truncf %28 : vector<1x256xf32> to vector<1x256xbf16>
    %30 = vector.broadcast %29 : vector<1x256xbf16> to vector<16x256xbf16>
    %31 = arith.addf %27, %30 : vector<16x256xbf16>
    %cst_19 = arith.constant 0.000000e+00 : bf16
    %32 = vector.broadcast %cst_19 : bf16 to vector<16x256xbf16>
    %33 = arith.maximumf %31, %32 : vector<16x256xbf16>
    %c0_20 = arith.constant 0 : index
    %c0_21 = arith.constant 0 : index
    %34 = vector.load %arg8[%c0_20, %c0_21] : memref<256x128xbf16, #tpu.memory_space<vmem>>, vector<256x128xbf16>
    %cst_22 = arith.constant dense<0.000000e+00> : vector<16x128xf32>
    %35 = tpu.matmul %33, %34, %cst_22 {dimension_numbers = #tpu.dot_dimension_numbers<[1], [0], [0], [1], [0, 0, 1, 1], [], []>} : vector<16x256xbf16>, vector<256x128xbf16>, vector<16x128xf32> -> vector<16x128xf32>
    %36 = arith.truncf %35 : vector<16x128xf32> to vector<16x128xbf16>
    %c0_23 = arith.constant 0 : index
    %c0_24 = arith.constant 0 : index
    %37 = vector.load %arg9[%c0_23, %c0_24] : memref<1x128xf32, #tpu.memory_space<vmem>>, vector<1x128xf32>
    %38 = arith.truncf %37 : vector<1x128xf32> to vector<1x128xbf16>
    %39 = vector.broadcast %38 : vector<1x128xbf16> to vector<16x128xbf16>
    %40 = arith.addf %36, %39 : vector<16x128xbf16>
    %cst_25 = arith.constant 0.000000e+00 : bf16
    %41 = vector.broadcast %cst_25 : bf16 to vector<16x128xbf16>
    %42 = arith.maximumf %40, %41 : vector<16x128xbf16>
    %c0_26 = arith.constant 0 : index
    %c0_27 = arith.constant 0 : index
    %43 = vector.load %arg10[%c0_26, %c0_27] : memref<128x64xbf16, #tpu.memory_space<vmem>>, vector<128x64xbf16>
    %cst_28 = arith.constant dense<0.000000e+00> : vector<16x64xf32>
    %44 = tpu.matmul %42, %43, %cst_28 {dimension_numbers = #tpu.dot_dimension_numbers<[1], [0], [0], [1], [0, 0, 1, 1], [], []>} : vector<16x128xbf16>, vector<128x64xbf16>, vector<16x64xf32> -> vector<16x64xf32>
    %45 = arith.truncf %44 : vector<16x64xf32> to vector<16x64xbf16>
    %c0_29 = arith.constant 0 : index
    %c0_30 = arith.constant 0 : index
    %46 = vector.load %arg11[%c0_29, %c0_30] : memref<1x64xf32, #tpu.memory_space<vmem>>, vector<1x64xf32>
    %47 = arith.truncf %46 : vector<1x64xf32> to vector<1x64xbf16>
    %48 = vector.broadcast %47 : vector<1x64xbf16> to vector<16x64xbf16>
    %49 = arith.addf %45, %48 : vector<16x64xbf16>
    %cst_31 = arith.constant 0.000000e+00 : bf16
    %50 = vector.broadcast %cst_31 : bf16 to vector<16x64xbf16>
    %51 = arith.maximumf %49, %50 : vector<16x64xbf16>
    %c0_32 = arith.constant 0 : index
    %c0_33 = arith.constant 0 : index
    %52 = vector.load %arg12[%c0_32, %c0_33] : memref<64x1xbf16, #tpu.memory_space<vmem>>, vector<64x1xbf16>
    %cst_34 = arith.constant dense<0.000000e+00> : vector<16x1xf32>
    %53 = tpu.matmul %51, %52, %cst_34 {dimension_numbers = #tpu.dot_dimension_numbers<[1], [0], [0], [1], [0, 0, 1, 1], [], []>} : vector<16x64xbf16>, vector<64x1xbf16>, vector<16x1xf32> -> vector<16x1xf32>
    %c0_35 = arith.constant 0 : index
    %c0_36 = arith.constant 0 : index
    %54 = vector.load %arg13[%c0_35, %c0_36] : memref<1x1xf32, #tpu.memory_space<vmem>>, vector<1x1xf32>
    %55 = vector.broadcast %54 : vector<1x1xf32> to vector<16x1xf32>
    %56 = arith.addf %53, %55 : vector<16x1xf32>
    %57 = arith.negf %56 : vector<16x1xf32>
    %58 = math.exp %57 : vector<16x1xf32>
    %cst_37 = arith.constant 1.000000e+00 : f32
    %59 = vector.broadcast %cst_37 : f32 to vector<16x1xf32>
    %60 = arith.addf %59, %58 : vector<16x1xf32>
    %61 = arith.divf %59, %60 : vector<16x1xf32>
    %c0_38 = arith.constant 0 : index
    %c0_39 = arith.constant 0 : index
    %62 = vector.load %arg14[%c0_38, %c0_39] : memref<16x1xf32, #tpu.memory_space<vmem>>, vector<16x1xf32>
    tpu.vector_store %arg14[%c0_38, %c0_39], %61 {strides = array<i32>} : memref<16x1xf32, #tpu.memory_space<vmem>>, vector<16x1xf32>,
    return
  }
  func.func @transform_0(%arg0: i32) -> (i32, i32) {
    %c0_i32 = arith.constant 0 : i32
    %c0_i32_0 = arith.constant 0 : i32
    return %arg0, %c0_i32 : i32, i32
  }
  func.func @transform_1(%arg0: i32) -> (i32, i32) {
    %c0_i32 = arith.constant 0 : i32
    %c0_i32_0 = arith.constant 0 : i32
    %c0_i32_1 = arith.constant 0 : i32
    return %c0_i32, %c0_i32_0 : i32, i32
  }
  func.func @transform_2(%arg0: i32) -> (i32, i32) {
    %c0_i32 = arith.constant 0 : i32
    %c0_i32_0 = arith.constant 0 : i32
    %c0_i32_1 = arith.constant 0 : i32
    return %c0_i32, %c0_i32_0 : i32, i32
  }
  func.func @transform_3(%arg0: i32) -> (i32, i32) {
    %c0_i32 = arith.constant 0 : i32
    %c0_i32_0 = arith.constant 0 : i32
    %c0_i32_1 = arith.constant 0 : i32
    return %c0_i32, %c0_i32_0 : i32, i32
  }
  func.func @transform_4(%arg0: i32) -> (i32, i32) {
    %c0_i32 = arith.constant 0 : i32
    %c0_i32_0 = arith.constant 0 : i32
    %c0_i32_1 = arith.constant 0 : i32
    return %c0_i32, %c0_i32_0 : i32, i32
  }
  func.func @transform_5(%arg0: i32) -> (i32, i32) {
    %c0_i32 = arith.constant 0 : i32
    %c0_i32_0 = arith.constant 0 : i32
    %c0_i32_1 = arith.constant 0 : i32
    return %c0_i32, %c0_i32_0 : i32, i32
  }
  func.func @transform_6(%arg0: i32) -> (i32, i32) {
    %c0_i32 = arith.constant 0 : i32
    %c0_i32_0 = arith.constant 0 : i32
    %c0_i32_1 = arith.constant 0 : i32
    return %c0_i32, %c0_i32_0 : i32, i32
  }
  func.func @transform_7(%arg0: i32) -> (i32, i32) {
    %c0_i32 = arith.constant 0 : i32
    %c0_i32_0 = arith.constant 0 : i32
    %c0_i32_1 = arith.constant 0 : i32
    return %c0_i32, %c0_i32_0 : i32, i32
  }
  func.func @transform_8(%arg0: i32) -> (i32, i32) {
    %c0_i32 = arith.constant 0 : i32
    %c0_i32_0 = arith.constant 0 : i32
    %c0_i32_1 = arith.constant 0 : i32
    return %c0_i32, %c0_i32_0 : i32, i32
  }
  func.func @transform_9(%arg0: i32) -> (i32, i32) {
    %c0_i32 = arith.constant 0 : i32
    %c0_i32_0 = arith.constant 0 : i32
    %c0_i32_1 = arith.constant 0 : i32
    return %c0_i32, %c0_i32_0 : i32, i32
  }
  func.func @transform_10(%arg0: i32) -> (i32, i32) {
    %c0_i32 = arith.constant 0 : i32
    %c0_i32_0 = arith.constant 0 : i32
    %c0_i32_1 = arith.constant 0 : i32
    return %c0_i32, %c0_i32_0 : i32, i32
  }
  func.func @transform_11(%arg0: i32) -> (i32, i32) {
    %c0_i32 = arith.constant 0 : i32
    %c0_i32_0 = arith.constant 0 : i32
    %c0_i32_1 = arith.constant 0 : i32
    return %c0_i32, %c0_i32_0 : i32, i32
  }
  func.func @transform_12(%arg0: i32) -> (i32, i32) {
    %c0_i32 = arith.constant 0 : i32
    %c0_i32_0 = arith.constant 0 : i32
    %c0_i32_1 = arith.constant 0 : i32
    return %c0_i32, %c0_i32_0 : i32, i32
  }
  func.func @transform_13(%arg0: i32) -> (i32, i32) {
    %c0_i32 = arith.constant 0 : i32
    %c0_i32_0 = arith.constant 0 : i32
    return %arg0, %c0_i32 : i32, i32
  }
  func.func @transform_14(%arg0: i32) -> (i32, i32) {
    %c0_i32 = arith.constant 0 : i32
    %c0_i32_0 = arith.constant 0 : i32
    return %arg0, %c0_i32 : i32, i32
  }
}

</mosaic_0001>

<bundles_post_ra>
// kernel: dae_ncf_forward.1
= control target key start
LH: loop header
LB: loop body
LE: loop exit
PB: predicated region body
PF: predicated region fallthrough
CT: control target
= control target key end

     0   :  { %s1343_s0 = inlined_call_operand.vmem [shape: f32[16,64], index: 0, kind: input, shape index: {}]   ;;  %s1344_s1 = inlined_call_operand.vmem [shape: bf16[64,64], index: 1, kind: input, shape index: {}]   ;;  %s1345_s2 = inlined_call_operand.vmem [shape: f32[1,64], index: 2, kind: input, shape index: {}]   ;;  %s1346_s3 = inlined_call_operand.vmem [shape: bf16[64,64], index: 3, kind: input, shape index: {}]   ;;  %s1347_s4 = inlined_call_operand.vmem [shape: f32[1,64], index: 4, kind: input, shape index: {}]   ;;  %s1348_s5 = inlined_call_operand.vmem [shape: bf16[64,256], index: 5, kind: input, shape index: {}]   ;;  %s1349_s6 = inlined_call_operand.vmem [shape: f32[1,256], index: 6, kind: input, shape index: {}]   ;;  %s1350_s7 = inlined_call_operand.vmem [shape: bf16[256,128], index: 7, kind: input, shape index: {}]   ;;  %s1351_s8 = inlined_call_operand.vmem [shape: f32[1,128], index: 8, kind: input, shape index: {}]   ;;  %s1352_s9 = inlined_call_operand.vmem [shape: bf16[128,64], index: 9, kind: input, shape index: {}]   ;;  %s1353_s10 = inlined_call_operand.vmem [shape: f32[1,64], index: 10, kind: input, shape index: {}]   ;;  %s1354_s11 = inlined_call_operand.vmem [shape: bf16[64,1], index: 11, kind: input, shape index: {}]   ;;  %s1355_s12 = inlined_call_operand.<no memory space> [shape: f32[1,1], index: 12, kind: input, shape index: {}]   ;;  %s1356_s13 = inlined_call_operand.vmem [shape: f32[16,1], index: 13, kind: output, shape index: {0}]   ;;  %s1357_s14 = inlined_call_operand.hbm [shape: f32[16,64], index: 14, kind: output, shape index: {1}]  }
   0x1   :  { %v20_v0 = vstv %s1355_s12 }
   0x2   :  { %21 = vst [vmem:[#allocation2] sm:$0x1] %v20_v0 }
   0x3   :  { %v957_v1 = vld [vmem:[%s1344_s1 + $0x18] sm:$0xff]   ;;  %v1051_v2 = vmov 0.0   ;;  %v958_v3 = vld [vmem:[%s1344_s1 + $0x10] sm:$0xff]   ;;  %vm1052_vm0 = vmmov 0   ;;  %v959_v4 = vld [vmem:[%s1344_s1 + $0x8] sm:$0xff]   ;;  %vm92_vm1 = vcmask 523264  }
   0x4   :  { %895 = vmatprep.subr.bf16.mxu0 %v1051_v2  ;;  %907 = vmatprep.subr.bf16.mxu1 %v1051_v2  ;;  %v960_v5 = vld [vmem:[%s1344_s1] sm:$0xff]   ;;  %v51_v7 = vld [vmem:[%s1343_s0 + $0x8] sm:$0xff] }
   0x5   :  { %896 = vmatpush3.bf16.msra.mxu0 %v957_v1  ;;  %903 = vmatprep.mubr.msk.bf16.mxu0 %vm1052_vm0, %v1051_v2  ;;  %v50_v6 = vld [vmem:[%s1343_s0] sm:$0xff] }
   0x6   :  { %897 = vmatprep.subr.bf16.mxu0 %v1051_v2  ;;  %915 = vmatprep.mubr.msk.bf16.mxu1 %vm1052_vm0, %v1051_v2  ;;  %v52_v8 = vpack.c.bf16 %v51_v7, %v50_v6 }
   0x9   :  { %898 = vmatpush3.bf16.msra.mxu0 %v958_v3 }
   0xa   :  { %899 = vmatprep.subr.bf16.mxu0 %v1051_v2 }
   0xd   :  { %900 = vmatpush3.bf16.msra.mxu0 %v959_v4 }
   0xe   :  { %901 = vmatprep.subr.bf16.mxu0 %v1051_v2 }
  0x11   :  { %902 = vmatpush3.bf16.msra.mxu0 %v960_v5 }
  0x14   :  { %904 = vmatmul.mubr.msk.bf16.vlgmr.msra.gmra.mxu0 %vm92_vm1, %v52_v8 }
  0x15   :  { %22 = vsyncpa [#allocation4], 0  ;;  %v961_v9 = vld [vmem:[%s1346_s3 + $0x18] sm:$0xff]   ;;  %v962_v10 = vld [vmem:[%s1346_s3 + $0x10] sm:$0xff]   ;;  %v1053_v37 = vmov 0  }
  0x16   :  { %908 = vmatpush3.bf16.msra.mxu1 %v961_v9  ;;  %v963_v11 = vld [vmem:[%s1346_s3 + $0x8] sm:$0xff]   ;;  %v964_v12 = vld [vmem:[%s1346_s3] sm:$0xff]   ;;  %v967_v29 = vld [vmem:[%s1348_s5 + $0x34] ss:$8 sps:$4 sm:$0xff]   ;;  %331 = vmatprep.mubr.bf16.mxu0 %v1053_v37 }
  0x17   :  { %909 = vmatprep.subr.bf16.mxu1 %v1051_v2  ;;  %v792_v13 = vld [vmem:[%s1345_s2] ss:$0 sm:$0xff]  ;;  %v965_v30 = vld [vmem:[%s1348_s5 + $0x30] ss:$8 sps:$4 sm:$0xff]   ;;  %307 = vmatprep.subr.bf16.mxu0 %v967_v29  ;;  %v970_v31 = vld [vmem:[%s1348_s5 + $0x24] ss:$8 sps:$4 sm:$0xff]  }
  0x18   :  { %308 = vmatpush1.bf16.msra.mxu0 %v965_v30  ;;  %v968_v32 = vld [vmem:[%s1348_s5 + $0x20] ss:$8 sps:$4 sm:$0xff]   ;;  %v973_v33 = vld [vmem:[%s1348_s5 + $0x14] ss:$8 sps:$4 sm:$0xff]   ;;  %v971_v34 = vld [vmem:[%s1348_s5 + $0x10] ss:$8 sps:$4 sm:$0xff]  }
  0x19   :  { %309 = vmatprep.subr.bf16.mxu0 %v970_v31  ;;  %v976_v35 = vld [vmem:[%s1348_s5 + $0x4] ss:$8 sps:$4 sm:$0xff]   ;;  %v974_v36 = vld [vmem:[%s1348_s5] ss:$8 sps:$4 sm:$0xff]   ;;  %v977_v38 = vld [vmem:[%s1350_s7 + $0x78] sm:$0xff]  }
  0x1a   :  { %910 = vmatpush3.bf16.msra.mxu1 %v962_v10  ;;  %v978_v39 = vld [vmem:[%s1350_s7 + $0x38] sm:$0xff]   ;;  %v979_v40 = vld [vmem:[%s1350_s7 + $0x70] sm:$0xff]   ;;  %v981_v42 = vld [vmem:[%s1350_s7 + $0x68] sm:$0xff]  }
  0x1b   :  { %911 = vmatprep.subr.bf16.mxu1 %v1051_v2  ;;  %v980_v41 = vld [vmem:[%s1350_s7 + $0x30] sm:$0xff]   ;;  %v982_v43 = vld [vmem:[%s1350_s7 + $0x28] sm:$0xff]   ;;  %v983_v44 = vld [vmem:[%s1350_s7 + $0x60] sm:$0xff]  }
  0x1c   :  { %310 = vmatpush1.bf16.msra.mxu0 %v968_v32  ;;  %v984_v45 = vld [vmem:[%s1350_s7 + $0x20] sm:$0xff]   ;;  %v985_v46 = vld [vmem:[%s1350_s7 + $0x58] sm:$0xff]   ;;  %v987_v0 = vld [vmem:[%s1350_s7 + $0x50] sm:$0xff]  }
  0x1d   :  { %311 = vmatprep.subr.bf16.mxu0 %v973_v33  ;;  %v986_v47 = vld [vmem:[%s1350_s7 + $0x18] sm:$0xff]   ;;  %v800_v48 = vld [vmem:[%s1347_s4] ss:$0 sm:$0xff]  ;;  %v988_v1 = vld [vmem:[%s1350_s7 + $0x10] sm:$0xff]  }
  0x1e   :  { %912 = vmatpush3.bf16.msra.mxu1 %v963_v11  ;;  %v989_v3 = vld [vmem:[%s1350_s7 + $0x48] sm:$0xff]   ;;  %v991_v5 = vld [vmem:[%s1350_s7 + $0x40] sm:$0xff]   ;;  %v993_v7 = vld [vmem:[%s1352_s9 + $0x38] sm:$0xff]   ;;  %v346_v11 = vlaneseq }
  0x1f   :  { %913 = vmatprep.subr.bf16.mxu1 %v1051_v2  ;;  %v990_v4 = vld [vmem:[%s1350_s7 + $0x8] sm:$0xff]   ;;  %v992_v6 = vld [vmem:[%s1350_s7] sm:$0xff]   ;;  %v994_v8 = vld [vmem:[%s1352_s9 + $0x30] sm:$0xff]  }
  0x20   :  { %312 = vmatpush1.bf16.msra.mxu0 %v971_v34  ;;  %v995_v9 = vld [vmem:[%s1352_s9 + $0x28] sm:$0xff]   ;;  %v996_v10 = vld [vmem:[%s1352_s9 + $0x20] sm:$0xff]   ;;  %v997_v34 = vld [vmem:[%s1352_s9 + $0x18] sm:$0xff]  }
  0x21   :  { %313 = vmatprep.subr.bf16.mxu0 %v976_v35  ;;  %v998_v35 = vld [vmem:[%s1352_s9 + $0x10] sm:$0xff]  }
  0x22   :  { %914 = vmatpush3.bf16.msra.mxu1 %v964_v12  ;;  %v347_v12 = vshrl.u32 %v346_v11, 7 }
  0x23   :  { %859 = vmatprep.subr.bf16.mxu1 %v977_v38  ;;  %v1000_v38 = vld [vmem:[%s1352_s9] sm:$0xff]  }
  0x24   :  { %314 = vmatpush1.bf16.msra.mxu0 %v974_v36  ;;  %v999_v36 = vld [vmem:[%s1352_s9 + $0x8] sm:$0xff]  }
  0x25   :  { %919 = vmatprep.subr.bf16.mxu0 %v1051_v2 }
  0xd4   :  { %v130_v14 = vpop.f32.mrf.mxu0 }
  0xd5   :  { %v131_v15 = vadd.f32 %v792_v13, %v130_v14  ;;  %v344_v14 = vld [vmem:[%s1349_s6] sm:$0x3] }
  0xd6   :  { %v905_v16 = vpop.f32.mrf.mxu0 }
  0xd7   :  { %v798_v17 = vmul.f32 -1.442695, %v131_v15  ;;  %v352_v15 = vsub.s32 1, %v347_v12 }
  0xd8   :  { %v133_v18 = vpop.f32.mrf.mxu0 }
  0xd9   :  { %1005 = vpow2.f32 %v798_v17  ;;  %v134_v19 = vadd.f32 %v792_v13, %v133_v18  ;;  %v1281_v13 = vsub.s32 0, %v347_v12  ;;  %v353_v17 = vrot.slane %v344_v14, %v352_v15 }
  0xda   :  { %v906_v20 = vpop.f32.mrf.mxu0 }
  0xdb   :  { %v799_v21 = vmul.f32 -1.442695, %v134_v19  ;;  %v349_v16 = vrot.slane %v344_v14, %v1281_v13  ;;  %v357_v19 = vpack.c.bf16 %v353_v17, %v353_v17 }
  0xdd   :  { %1007 = vpow2.f32 %v799_v21  ;;  %v356_v18 = vpack.c.bf16 %v349_v16, %v349_v16 }
  0xdf   :  { %v359_v21 = vpack.i.b16 %v356_v18, %v356_v18 }
  0xe6   :  { %v1006_v22 = vpop.eup %1005 }
  0xe7   :  { %v143_v23 = vadd.f32 1.0, %v1006_v22  ;;  %v366_v22 = vpack.i.b16 %v357_v19, %v357_v19 }
  0xe9   :  { %1009 = vrcp.f32 %v143_v23 }
  0xea   :  { %v1008_v24 = vpop.eup %1007 }
  0xeb   :  { %v144_v25 = vadd.f32 1.0, %v1008_v24 }
  0xed   :  { %1011 = vrcp.f32 %v144_v25  ;;  %v364_v25 = vrot.slane %v359_v21, %v1281_v13 }
  0xf6   :  { %v1010_v26 = vpop.eup %1009 }
  0xfa   :  { %v1012_v27 = vpop.eup %1011 }
  0xfb   :  { %v149_v28 = vpack.c.bf16 %v1012_v27, %v1010_v26  ;;  %v371_v27 = vrot.slane %v366_v22, %v1281_v13 }
  0xfd   :  { %916 = vmatmul.mubr.msk.bf16.vlgmr.msra.gmra.mxu1 %vm92_vm1, %v149_v28 }
  0xfe   :  { %860 = vmatpush3.bf16.msra.mxu1 %v978_v39  ;;  %v1001_v39 = vld [vmem:[%s1354_s11 + $0x18] sm:$0xff]  }
  0xff   :  { %861 = vmatprep.subr.bf16.mxu1 %v979_v40  ;;  %v546_v40 = vld [vmem:[%s1351_s8] sm:$0x1] }
 0x102   :  { %862 = vmatpush3.bf16.msra.mxu1 %v980_v41  ;;  %v547_v41 = vpack.c.bf16 %v546_v40, %v546_v40 }
 0x103   :  { %863 = vmatprep.subr.bf16.mxu1 %v981_v42 }
 0x106   :  { %864 = vmatpush3.bf16.msra.mxu1 %v982_v43 }
 0x107   :  { %865 = vmatprep.subr.bf16.mxu1 %v983_v44  ;;  %v549_v44 = vpack.i.b16 %v547_v41, %v547_v41 }
 0x10a   :  { %866 = vmatpush3.bf16.msra.mxu1 %v984_v45 }
 0x10b   :  { %867 = vmatprep.subr.bf16.mxu1 %v985_v46 }
 0x10e   :  { %868 = vmatpush3.bf16.msra.mxu1 %v986_v47 }
 0x10f   :  { %869 = vmatprep.subr.bf16.mxu1 %v987_v0 }
 0x112   :  { %870 = vmatpush3.bf16.msra.mxu1 %v988_v1 }
 0x113   :  { %871 = vmatprep.subr.bf16.mxu1 %v989_v3 }
 0x116   :  { %872 = vmatpush3.bf16.msra.mxu1 %v990_v4 }
 0x117   :  { %873 = vmatprep.subr.bf16.mxu1 %v991_v5 }
 0x11a   :  { %874 = vmatpush3.bf16.msra.mxu1 %v992_v6 }
 0x11b   :  { %939 = vmatprep.subr.bf16.mxu1 %v1051_v2 }
 0x1bd   :  { %v226_v49 = vpop.f32.mrf.mxu1 }
 0x1be   :  { %v227_v50 = vadd.f32 %v800_v48, %v226_v49  ;;  %v554_v49 = vrot.slane %v549_v44, %v1281_v13 }
 0x1bf   :  { %v917_v51 = vpop.f32.mrf.mxu1 }
 0x1c0   :  { %v806_v52 = vmul.f32 -1.442695, %v227_v50 }
 0x1c1   :  { %v229_v53 = vpop.f32.mrf.mxu1 }
 0x1c2   :  { %1013 = vpow2.f32 %v806_v52  ;;  %v230_v54 = vadd.f32 %v800_v48, %v229_v53  ;;  %v1002_v53 = vld [vmem:[%s1354_s11 + $0x10] sm:$0xff]  }
 0x1c3   :  { %v918_v55 = vpop.f32.mrf.mxu1 }
 0x1c4   :  { %v807_v56 = vmul.f32 -1.442695, %v230_v54  ;;  %v1003_v54 = vld [vmem:[%s1354_s11 + $0x8] sm:$0xff]   ;;  %v1004_v55 = vld [vmem:[%s1354_s11] sm:$0xff]   ;;  %s1054_s11 = smov [#allocation3]  }
 0x1c5   :  { %s779_s23 = sshll.u32 %s1054_s11, 4  ;;  %s780_s23 = int_to_ptr.vmem [resolvable:$true] %s779_s23 }
 0x1c6   :  { %1015 = vpow2.f32 %v807_v56  ;;  %v663_v56 = vld [vmem:[%s1353_s10] sm:$0x1]  ;;  %s1029_s24 = scalar_lea.vmem %s780_s23, 256  ;;  %p1034_p1 = scmp.lt.s32.totalorder %s780_s23, %s780_s23 }
 0x1c7   :  { %p1030_p0 = scmp.ne.s32.totalorder %s780_s23, %s1029_s24  ;;  %p1035_p2 = scmp.lt.s32.totalorder %s1029_s24, %s1029_s24 }
 0x1c9   :  { %p1036_p3 = por %p1035_p2, %p1034_p1 }
 0x1cb   :  { %p1037_p4 = pnand %p1036_p3, %p1030_p0 }
 0x1cf   :  { %v1014_v57 = vpop.eup %1013 }
 0x1d0   :  { %v239_v58 = vadd.f32 1.0, %v1014_v57  ;;  %v664_v57 = vpack.c.bf16 %v663_v56, %v663_v56 }
 0x1d2   :  { %1017 = vrcp.f32 %v239_v58  ;;  %v666_v58 = vpack.i.b16 %v664_v57, %v664_v57 }
 0x1d3   :  { %v1016_v59 = vpop.eup %1015 }
 0x1d4   :  { %v240_v60 = vadd.f32 1.0, %v1016_v59 }
 0x1d6   :  { %1019 = vrcp.f32 %v240_v60 }
 0x1df   :  { %v1018_v61 = vpop.eup %1017 }
 0x1e0   :  { %245 = vst.msk [vmem:[#allocation3] sm:$0xff] %vm92_vm1, %v1018_v61 }
 0x1e3   :  { %v1020_v62 = vpop.eup %1019 }
 0x1e4   :  { %246 = vst.msk [vmem:[#allocation3 + $0x8] sm:$0xff] %vm92_vm1, %v1020_v62  ;;  %v247_v63 = vpack.c.bf16 %v1020_v62, %v1018_v61  ;;  %v671_v61 = vrot.slane %v666_v58, %v1281_v13 }
 0x1e6   :  { %816 = vmatmul.mubr.msk.bf16.vlgmr.msra.gmra.mxu0 %vm92_vm1, %v247_v63 }
 0x1e7   :  { %935 = vmatprep.mubr.msk.bf16.mxu0 %vm1052_vm0, %v1051_v2  ;;  %920 = vmatpush3.bf16.msra.mxu0 %v993_v7 }
 0x1e8   :  { %921 = vmatprep.subr.bf16.mxu0 %v1051_v2 }
 0x1eb   :  { %922 = vmatpush3.bf16.msra.mxu0 %v994_v8 }
 0x1ec   :  { %923 = vmatprep.subr.bf16.mxu0 %v1051_v2 }
 0x1ef   :  { %924 = vmatpush3.bf16.msra.mxu0 %v995_v9 }
 0x1f0   :  { %925 = vmatprep.subr.bf16.mxu0 %v1051_v2 }
 0x1f3   :  { %926 = vmatpush3.bf16.msra.mxu0 %v996_v10 }
 0x1f4   :  { %927 = vmatprep.subr.bf16.mxu0 %v1051_v2 }
 0x1f7   :  { %928 = vmatpush3.bf16.msra.mxu0 %v997_v34 }
 0x1f8   :  { %929 = vmatprep.subr.bf16.mxu0 %v1051_v2 }
 0x1fb   :  { %930 = vmatpush3.bf16.msra.mxu0 %v998_v35 }
 0x1fc   :  { %931 = vmatprep.subr.bf16.mxu0 %v1051_v2 }
 0x1ff   :  { %932 = vmatpush3.bf16.msra.mxu0 %v999_v36 }
 0x200   :  { %933 = vmatprep.subr.bf16.mxu0 %v1051_v2 }
 0x203   :  { %934 = vmatpush3.bf16.msra.mxu0 %v1000_v38 }
 0x2a6   :  { %v333_v20 = vpop.f32.mrf.mxu0 }
 0x2a8   :  { %v335_v23 = vpop.f32.mrf.mxu0 }
 0x2aa   :  { %v337_v24 = vpop.f32.mrf.mxu0 }
 0x2ab   :  { %v342_v26 = vpack.c.bf16 %v337_v24, %v333_v20 }
 0x2ac   :  { %v339_v28 = vpop.f32.mrf.mxu0 }
 0x2ad   :  { %v343_v29 = vpack.c.bf16 %v339_v28, %v335_v23  ;;  %v372_v30 = vadd.bf16 %v364_v25, %v342_v26 }
 0x2af   :  { %v373_v31 = vadd.bf16 %v371_v27, %v343_v29  ;;  %v374_v33 = vmax.bf16 %v1053_v37, %v372_v30 }
 0x2b1   :  { %v375_v32 = vmax.bf16 %v1053_v37, %v373_v31 }
 0x2b3   :  { %536 = vmatprep.mubr.bf16.mxu1 %v375_v32 }
 0x2b4   :  { %537 = vmatmul.mubr.bf16.vlgmr.msra.gmra.mxu1 %v374_v33 }
 0x2b5   :  { %947 = vmatprep.mubr.msk.bf16.mxu1 %vm1052_vm0, %v1051_v2  ;;  %940 = vmatpush3.bf16.msra.mxu1 %v1001_v39 }
 0x2b6   :  { %941 = vmatprep.subr.bf16.mxu1 %v1051_v2 }
 0x2b9   :  { %942 = vmatpush3.bf16.msra.mxu1 %v1002_v53 }
 0x2ba   :  { %943 = vmatprep.subr.bf16.mxu1 %v1051_v2 }
 0x2bd   :  { %944 = vmatpush3.bf16.msra.mxu1 %v1003_v54 }
 0x2be   :  { %945 = vmatprep.subr.bf16.mxu1 %v1051_v2 }
 0x2c1   :  { %946 = vmatpush3.bf16.msra.mxu1 %v1004_v55 }
 0x374   :  { %v875_v42 = vpop.f32.mrf.mxu1 }
 0x376   :  { %v876_v43 = vpop.f32.mrf.mxu1 }
 0x377   :  { %v877_v47 = vadd.f32 %v876_v43, %v875_v42 }
 0x378   :  { %v878_v45 = vpop.f32.mrf.mxu1 }
 0x37a   :  { %v879_v46 = vpop.f32.mrf.mxu1 }
 0x37b   :  { %v880_v48 = vadd.f32 %v879_v46, %v878_v45 }
 0x37d   :  { %v545_v50 = vpack.c.bf16 %v880_v48, %v877_v47 }
 0x37f   :  { %v555_v51 = vadd.bf16 %v554_v49, %v545_v50 }
 0x381   :  { %v556_v52 = vmax.bf16 %v1053_v37, %v555_v51 }
 0x383   :  { %936 = vmatmul.mubr.bf16.vlgmr.msra.gmra.mxu0 %v556_v52 }
 0x443   :  { %v655_v59 = vpop.f32.mrf.mxu0 }
 0x445   :  { %v937_v60 = vpop.f32.mrf.mxu0 }
 0x447   :  { %v658_v62 = vpop.f32.mrf.mxu0 }
 0x448   :  { %v662_v63 = vpack.c.bf16 %v658_v62, %v655_v59 }
 0x449   :  { %v938_v0 = vpop.f32.mrf.mxu0 }
 0x44a   :  { %v672_v1 = vadd.bf16 %v671_v61, %v662_v63 }
 0x44c   :  { %v673_v2 = vmax.bf16 %v1053_v37, %v672_v1 }
 0x44e   :  { %948 = vmatmul.mubr.msk.bf16.vlgmr.msra.gmra.mxu1 %vm92_vm1, %v673_v2 }
 0x44f   :  { %1040 = shalt.err (!%p1037_p4)
}
 0x450   :  { %s1055_s10 = smov 128   ;;  %s1056_s25 = smov 8   ;;  %v841_v3 = vld [vmem:[#allocation2] ss:$0 sm:$0xff]  ;;  %vm769_vm2 = vcmask 7168  }
 0x451   :  { %785 = dma.vmem_to_hbm [thread:$0]  %s780_s23, 256, %s1357_s14, [#allocation4], %s1055_s10, %s1055_s10, %s1056_s25  }
 0x50e   :  { %v750_v37 = vpop.f32.mrf.mxu1 }
 0x50f   :  { %v751_v4 = vadd.f32 %v841_v3, %v750_v37 }
 0x510   :  { %v949_v5 = vpop.f32.mrf.mxu1 }
 0x511   :  { %v847_v6 = vmul.f32 -1.442695, %v751_v4 }
 0x512   :  { %v753_v7 = vpop.f32.mrf.mxu1 }
 0x513   :  { %1021 = vpow2.f32 %v847_v6  ;;  %v754_v8 = vadd.f32 %v841_v3, %v753_v7 }
 0x514   :  { %v950_v9 = vpop.f32.mrf.mxu1 }
 0x515   :  { %v848_v10 = vmul.f32 -1.442695, %v754_v8 }
 0x517   :  { %1023 = vpow2.f32 %v848_v10 }
 0x520   :  { %v1022_v11 = vpop.eup %1021 }
 0x521   :  { %v763_v12 = vadd.f32 1.0, %v1022_v11 }
 0x523   :  { %1025 = vrcp.f32 %v763_v12 }
 0x524   :  { %v1024_v13 = vpop.eup %1023 }
 0x525   :  { %v764_v14 = vadd.f32 1.0, %v1024_v13 }
 0x527   :  { %1027 = vrcp.f32 %v764_v14 }
 0x530   :  { %v1026_v15 = vpop.eup %1025 }
 0x531   :  { %770 = vst.msk [vmem:[%s1356_s13] sm:$0xff] %vm769_vm2, %v1026_v15 }
 0x534   :  { %v1028_v16 = vpop.eup %1027 }
 0x535   :  { %771 = vst.msk [vmem:[%s1356_s13 + $0x8] sm:$0xff] %vm769_vm2, %v1028_v16 }
 0x536   :  { %1049 = dma.done.wait [#allocation4], 256  }
 0x537   :  { %1050 = vsyncadd [#allocation4], 4294967040 }
 0x538   :  { %791 = vsyncpa [#allocation4], 1 }

</bundles_post_ra>
